<compile_context>
chip_gen: v7x
topology: tpu7x:2x2x1
jax: 0.10.0
libtpu: 0.0.40
codegen_flags: <defaults>
</compile_context>

<pallas_src>
import jax
import jax.numpy as jnp
from jax import lax
from jax.experimental import pallas as pl
from jax.experimental.pallas import tpu as pltpu


def _downsample_kernel(x_ref, w_ref, shift_ref, out_ref):
    """One grid step == one (batch b, spatial tile n); all T timesteps in-kernel.

    x_ref    : (T, C_in, TN)  bf16 flattened (strided) input tile, all timesteps
    w_ref    : (C_out, C_in)  bf16 1x1 conv weight with BN scale folded in
    shift_ref: (C_out, 1)     f32  folded BN shift (beta - mean*scale)
    out_ref  : (T, C_out, TN) bf16 output spikes for this tile, all timesteps
    """
    w = w_ref[...]          # hoisted out of the T loop
    shift = shift_ref[...]
    n_t = x_ref.shape[0]

    def step(t, v):
        # 1x1 conv == channel matmul on the MXU (spatial axis in the lane dim).
        y = jnp.dot(w, x_ref[t], preferred_element_type=jnp.float32) + shift
        # IF neuron: charge, fire, hard reset.  f32 VPU math (v5e has no bf16 VPU).
        v = v + y
        fire = v >= 1.0
        out_ref[t] = jnp.where(fire, 1.0, 0.0).astype(out_ref.dtype)
        return jnp.where(fire, 0.0, v)

    lax.fori_loop(0, n_t, step,
                  jnp.zeros(out_ref.shape[1:], jnp.float32), unroll=True)


def _round_up(x, m):
    return (x + m - 1) // m * m


def _pick_spatial_tile(n, t, c_in, c_out, budget_bytes=12 << 20):
    """Largest lane tile that fits the VMEM budget; prefer 128-multiples dividing n."""
    # Per-lane working set: double-buffered bf16 input/output blocks (full T)
    # plus the f32 membrane carry.
    per_lane = 2 * (t * c_in * 2) + 2 * (t * c_out * 2) + 4 * c_out
    cap = max(128, (budget_bytes // per_lane) // 128 * 128)
    if n <= cap:
        return n
    best = 0
    for cand in range(128, cap + 1, 128):      # lane-dense divisors
        if n % cand == 0:
            best = cand
    if best:
        return best
    for cand in range(cap, 0, -1):             # any divisor: correct, maybe masked
        if n % cand == 0:
            return cand
    return n


def downsample_forward(x, conv_w, bn_gamma, bn_beta, bn_mean, bn_var,
                       stride=1, eps=1e-5):
    """x: (T, B, C_in, H, W) float32.  Returns (T, B, C_out, H', W') bf16 spikes."""
    T, B, C_in, H, W = x.shape
    C_out = conv_w.shape[0]

    # 1x1 conv with stride == spatial subsample; fused with the bf16 cast (and
    # the optional lane pad below) into a single small XLA pass.  Channels-first
    # is kept so no transposes are needed anywhere.
    xs = x[:, :, :, ::stride, ::stride] if stride != 1 else x
    Hp, Wp = xs.shape[3], xs.shape[4]
    N = Hp * Wp
    # Pad tiny feature maps up to a full 128-lane vreg so stores are unmasked.
    N_pad = _round_up(N, 128) if N < 128 else N

    x_flat = xs.reshape(T, B, C_in, N).astype(jnp.bfloat16)     # free reshape
    if N_pad != N:
        x_flat = jnp.pad(x_flat, ((0, 0), (0, 0), (0, 0), (0, N_pad - N)))

    # Fold BN: scale into the weight columns, shift kept as an f32 per-channel add.
    scale = bn_gamma / jnp.sqrt(bn_var + eps)                               # (C_out,)
    w_scaled = (conv_w.reshape(C_out, C_in) * scale[:, None]).astype(jnp.bfloat16)
    shift = (bn_beta - bn_mean * scale).reshape(C_out, 1).astype(jnp.float32)

    TN = _pick_spatial_tile(N_pad, T, C_in, C_out)
    grid = (B, N_pad // TN)          # no T axis: the kernel sweeps T internally

    out_flat = pl.pallas_call(
        _downsample_kernel,
        out_shape=jax.ShapeDtypeStruct((T, B, C_out, N_pad), jnp.bfloat16),
        grid_spec=pltpu.PrefetchScalarGridSpec(
            num_scalar_prefetch=0,
            grid=grid,
            in_specs=[
                pl.BlockSpec((T, pl.Squeezed(), C_in, TN),
                             lambda b, n: (0, b, 0, n)),
                pl.BlockSpec((C_out, C_in), lambda b, n: (0, 0)),
                pl.BlockSpec((C_out, 1), lambda b, n: (0, 0)),
            ],
            out_specs=pl.BlockSpec((T, pl.Squeezed(), C_out, TN),
                                   lambda b, n: (0, b, 0, n)),
        ),
        compiler_params=pltpu.CompilerParams(
            # Both axes are independent (membrane carry is in-kernel), so both
            # shard across TensorCores on v7x / megacore.
            dimension_semantics=("parallel", "parallel"),
            vmem_limit_bytes=32 << 20),
    )(x_flat, w_scaled, shift)

    if N_pad != N:
        out_flat = out_flat[..., :N]
    return out_flat.reshape(T, B, C_out, Hp, Wp)


if __name__ == "__main__":
    # Small, module-consistent shapes: T=4, B=2, inplanes=8, planes=16,
    # spatial 16x16, stride=2 -> output spatial 8x8.
    T, B, C_in, C_out, H, W, stride = 4, 2, 8, 16, 16, 16, 2

    key = jax.random.PRNGKey(0)
    kx, kw, kg, kb, km, kv = jax.random.split(key, 6)

    x = jax.random.normal(kx, (T, B, C_in, H, W), dtype=jnp.float32)

    # conv1x1 weight (bias=False): (C_out, C_in, 1, 1)
    conv_w = jax.random.normal(kw, (C_out, C_in, 1, 1), dtype=jnp.float32) * 0.3
    # BatchNorm2d(planes) parameters (deterministic, synthetic running stats)
    bn_gamma = 1.0 + 0.1 * jax.random.normal(kg, (C_out,), dtype=jnp.float32)
    bn_beta = 0.1 * jax.random.normal(kb, (C_out,), dtype=jnp.float32)
    bn_mean = 0.05 * jax.random.normal(km, (C_out,), dtype=jnp.float32)
    bn_var = 1.0 + 0.1 * jnp.abs(jax.random.normal(kv, (C_out,), dtype=jnp.float32))

    out = downsample_forward(x, conv_w, bn_gamma, bn_beta, bn_mean, bn_var,
                             stride=stride)
    out = jax.block_until_ready(out)

    assert out.shape == (T, B, C_out, H // stride, W // stride)
    out_f32 = out.astype(jnp.float32)
    # spikes are binary (exactly representable in bf16)
    assert bool(jnp.all((out_f32 == 0.0) | (out_f32 == 1.0)))

    # Reference in plain JAX using the same bf16-rounded conv inputs the kernel
    # sees (f32 accumulation), then IF dynamics over T.
    xs = x[:, :, :, ::stride, ::stride]
    scale = bn_gamma / jnp.sqrt(bn_var + 1e-5)
    w_s = (conv_w.reshape(C_out, C_in) * scale[:, None]).astype(jnp.bfloat16)
    y = jnp.einsum('oc,tbchw->tbohw',
                   w_s.astype(jnp.float32),
                   xs.astype(jnp.bfloat16).astype(jnp.float32))
    y = y + (bn_beta - bn_mean * scale)[None, None, :, None, None]
    v = jnp.zeros_like(y[0])
    ref = []
    for t in range(T):
        v = v + y[t]
        s = (v >= 1.0).astype(jnp.float32)
        v = v * (1.0 - s)
        ref.append(s)
    ref = jnp.stack(ref, axis=0)

    # Spikes are binary; tolerate (vanishingly rare) flips for membrane values
    # numerically at the 1.0 threshold due to MXU vs. XLA accumulation order.
    mismatch = float(jnp.mean(jnp.abs(out_f32 - ref)))
    assert mismatch < 1e-3, f"spike mismatch rate {mismatch}"

    print("KERNEL_OK")
</pallas_src>

<mosaic_0001>
module attributes {stable_mosaic.version = 11 : i64} {
  func.func @_downsample_kernel(%arg0: i32, %arg1: i32, %arg2: memref<4x1x8x128xbf16, #tpu.memory_space<vmem>>, %arg3: memref<16x8xbf16, #tpu.memory_space<vmem>>, %arg4: memref<16x1xf32, #tpu.memory_space<vmem>>, %arg5: memref<4x1x16x128xbf16, #tpu.memory_space<vmem>>) attributes {dimension_semantics = [#tpu.dimension_semantics<parallel>, #tpu.dimension_semantics<parallel>], iteration_bounds = array<i64: 2, 1>, scalar_prefetch = 0 : i64, scratch_operands = 0 : i64, tpu.core_type = #tpu.core_type<tc>, window_params = [{transform_indices = @transform_0, window_bounds = array<i64: 4, 1, 8, 128>}, {pipeline_mode = #tpu.pipeline_mode<synchronous>, transform_indices = @transform_1, window_bounds = array<i64: 16, 8>}, {pipeline_mode = #tpu.pipeline_mode<synchronous>, transform_indices = @transform_2, window_bounds = array<i64: 16, 1>}, {transform_indices = @transform_3, window_bounds = array<i64: 4, 1, 16, 128>}]} {
    %c0 = arith.constant 0 : index
    %c0_0 = arith.constant 0 : index
    %0 = vector.load %arg3[%c0, %c0_0] : memref<16x8xbf16, #tpu.memory_space<vmem>>, vector<16x8xbf16>
    %c0_1 = arith.constant 0 : index
    %c0_2 = arith.constant 0 : index
    %1 = vector.load %arg4[%c0_1, %c0_2] : memref<16x1xf32, #tpu.memory_space<vmem>>, vector<16x1xf32>
    %cst = arith.constant 0.000000e+00 : f32
    %2 = vector.broadcast %cst : f32 to vector<16x128xf32>
    %c0_i32 = arith.constant 0 : i32
    %3 = arith.index_cast %c0_i32 : i32 to index
    %c0_3 = arith.constant 0 : index
    %c0_4 = arith.constant 0 : index
    %c0_5 = arith.constant 0 : index
    %4 = vector.load %arg2[%3, %c0_3, %c0_4, %c0_5] : memref<4x1x8x128xbf16, #tpu.memory_space<vmem>>, vector<1x1x8x128xbf16>
    %5 = vector.shape_cast %4 : vector<1x1x8x128xbf16> to vector<8x128xbf16>
    %cst_6 = arith.constant dense<0.000000e+00> : vector<16x128xf32>
    %6 = tpu.matmul %0, %5, %cst_6 {dimension_numbers = #tpu.dot_dimension_numbers<[1], [0], [0], [1], [0, 0, 1, 1], [], []>} : vector<16x8xbf16>, vector<8x128xbf16>, vector<16x128xf32> -> vector<16x128xf32>
    %7 = vector.broadcast %1 : vector<16x1xf32> to vector<16x128xf32>
    %8 = arith.addf %6, %7 : vector<16x128xf32>
    %9 = arith.addf %2, %8 : vector<16x128xf32>
    %cst_7 = arith.constant 1.000000e+00 : f32
    %10 = vector.broadcast %cst_7 : f32 to vector<16x128xf32>
    %11 = arith.cmpf oge, %9, %10 : vector<16x128xf32>
    %cst_8 = arith.constant 1.000000e+00 : f32
    %cst_9 = arith.constant 0.000000e+00 : f32
    %12 = vector.broadcast %cst_8 : f32 to vector<16x128xf32>
    %13 = vector.broadcast %cst_9 : f32 to vector<16x128xf32>
    %14 = arith.select %11, %12, %13 : vector<16x128xi1>, vector<16x128xf32>
    %15 = arith.truncf %14 : vector<16x128xf32> to vector<16x128xbf16>
    %16 = arith.index_cast %c0_i32 : i32 to index
    %c0_10 = arith.constant 0 : index
    %c0_11 = arith.constant 0 : index
    %c0_12 = arith.constant 0 : index
    %17 = vector.load %arg5[%16, %c0_10, %c0_11, %c0_12] : memref<4x1x16x128xbf16, #tpu.memory_space<vmem>>, vector<1x1x16x128xbf16>
    %18 = vector.shape_cast %17 : vector<1x1x16x128xbf16> to vector<16x128xbf16>
    %19 = vector.shape_cast %15 : vector<16x128xbf16> to vector<1x1x16x128xbf16>
    tpu.vector_store %arg5[%16, %c0_10, %c0_11, %c0_12], %19 {strides = array<i32>} : memref<4x1x16x128xbf16, #tpu.memory_space<vmem>>, vector<1x1x16x128xbf16>,
    %cst_13 = arith.constant 0.000000e+00 : f32
    %20 = vector.broadcast %cst_13 : f32 to vector<16x128xf32>
    %21 = arith.select %11, %20, %9 : vector<16x128xi1>, vector<16x128xf32>
    %c1_i32 = arith.constant 1 : i32
    %22 = arith.index_cast %c1_i32 : i32 to index
    %c0_14 = arith.constant 0 : index
    %c0_15 = arith.constant 0 : index
    %c0_16 = arith.constant 0 : index
    %23 = vector.load %arg2[%22, %c0_14, %c0_15, %c0_16] : memref<4x1x8x128xbf16, #tpu.memory_space<vmem>>, vector<1x1x8x128xbf16>
    %24 = vector.shape_cast %23 : vector<1x1x8x128xbf16> to vector<8x128xbf16>
    %cst_17 = arith.constant dense<0.000000e+00> : vector<16x128xf32>
    %25 = tpu.matmul %0, %24, %cst_17 {dimension_numbers = #tpu.dot_dimension_numbers<[1], [0], [0], [1], [0, 0, 1, 1], [], []>} : vector<16x8xbf16>, vector<8x128xbf16>, vector<16x128xf32> -> vector<16x128xf32>
    %26 = vector.broadcast %1 : vector<16x1xf32> to vector<16x128xf32>
    %27 = arith.addf %25, %26 : vector<16x128xf32>
    %28 = arith.addf %21, %27 : vector<16x128xf32>
    %cst_18 = arith.constant 1.000000e+00 : f32
    %29 = vector.broadcast %cst_18 : f32 to vector<16x128xf32>
    %30 = arith.cmpf oge, %28, %29 : vector<16x128xf32>
    %cst_19 = arith.constant 1.000000e+00 : f32
    %cst_20 = arith.constant 0.000000e+00 : f32
    %31 = vector.broadcast %cst_19 : f32 to vector<16x128xf32>
    %32 = vector.broadcast %cst_20 : f32 to vector<16x128xf32>
    %33 = arith.select %30, %31, %32 : vector<16x128xi1>, vector<16x128xf32>
    %34 = arith.truncf %33 : vector<16x128xf32> to vector<16x128xbf16>
    %35 = arith.index_cast %c1_i32 : i32 to index
    %c0_21 = arith.constant 0 : index
    %c0_22 = arith.constant 0 : index
    %c0_23 = arith.constant 0 : index
    %36 = vector.load %arg5[%35, %c0_21, %c0_22, %c0_23] : memref<4x1x16x128xbf16, #tpu.memory_space<vmem>>, vector<1x1x16x128xbf16>
    %37 = vector.shape_cast %36 : vector<1x1x16x128xbf16> to vector<16x128xbf16>
    %38 = vector.shape_cast %34 : vector<16x128xbf16> to vector<1x1x16x128xbf16>
    tpu.vector_store %arg5[%35, %c0_21, %c0_22, %c0_23], %38 {strides = array<i32>} : memref<4x1x16x128xbf16, #tpu.memory_space<vmem>>, vector<1x1x16x128xbf16>,
    %cst_24 = arith.constant 0.000000e+00 : f32
    %39 = vector.broadcast %cst_24 : f32 to vector<16x128xf32>
    %40 = arith.select %30, %39, %28 : vector<16x128xi1>, vector<16x128xf32>
    %c2_i32 = arith.constant 2 : i32
    %41 = arith.index_cast %c2_i32 : i32 to index
    %c0_25 = arith.constant 0 : index
    %c0_26 = arith.constant 0 : index
    %c0_27 = arith.constant 0 : index
    %42 = vector.load %arg2[%41, %c0_25, %c0_26, %c0_27] : memref<4x1x8x128xbf16, #tpu.memory_space<vmem>>, vector<1x1x8x128xbf16>
    %43 = vector.shape_cast %42 : vector<1x1x8x128xbf16> to vector<8x128xbf16>
    %cst_28 = arith.constant dense<0.000000e+00> : vector<16x128xf32>
    %44 = tpu.matmul %0, %43, %cst_28 {dimension_numbers = #tpu.dot_dimension_numbers<[1], [0], [0], [1], [0, 0, 1, 1], [], []>} : vector<16x8xbf16>, vector<8x128xbf16>, vector<16x128xf32> -> vector<16x128xf32>
    %45 = vector.broadcast %1 : vector<16x1xf32> to vector<16x128xf32>
    %46 = arith.addf %44, %45 : vector<16x128xf32>
    %47 = arith.addf %40, %46 : vector<16x128xf32>
    %cst_29 = arith.constant 1.000000e+00 : f32
    %48 = vector.broadcast %cst_29 : f32 to vector<16x128xf32>
    %49 = arith.cmpf oge, %47, %48 : vector<16x128xf32>
    %cst_30 = arith.constant 1.000000e+00 : f32
    %cst_31 = arith.constant 0.000000e+00 : f32
    %50 = vector.broadcast %cst_30 : f32 to vector<16x128xf32>
    %51 = vector.broadcast %cst_31 : f32 to vector<16x128xf32>
    %52 = arith.select %49, %50, %51 : vector<16x128xi1>, vector<16x128xf32>
    %53 = arith.truncf %52 : vector<16x128xf32> to vector<16x128xbf16>
    %54 = arith.index_cast %c2_i32 : i32 to index
    %c0_32 = arith.constant 0 : index
    %c0_33 = arith.constant 0 : index
    %c0_34 = arith.constant 0 : index
    %55 = vector.load %arg5[%54, %c0_32, %c0_33, %c0_34] : memref<4x1x16x128xbf16, #tpu.memory_space<vmem>>, vector<1x1x16x128xbf16>
    %56 = vector.shape_cast %55 : vector<1x1x16x128xbf16> to vector<16x128xbf16>
    %57 = vector.shape_cast %53 : vector<16x128xbf16> to vector<1x1x16x128xbf16>
    tpu.vector_store %arg5[%54, %c0_32, %c0_33, %c0_34], %57 {strides = array<i32>} : memref<4x1x16x128xbf16, #tpu.memory_space<vmem>>, vector<1x1x16x128xbf16>,
    %cst_35 = arith.constant 0.000000e+00 : f32
    %58 = vector.broadcast %cst_35 : f32 to vector<16x128xf32>
    %59 = arith.select %49, %58, %47 : vector<16x128xi1>, vector<16x128xf32>
    %c3_i32 = arith.constant 3 : i32
    %60 = arith.index_cast %c3_i32 : i32 to index
    %c0_36 = arith.constant 0 : index
    %c0_37 = arith.constant 0 : index
    %c0_38 = arith.constant 0 : index
    %61 = vector.load %arg2[%60, %c0_36, %c0_37, %c0_38] : memref<4x1x8x128xbf16, #tpu.memory_space<vmem>>, vector<1x1x8x128xbf16>
    %62 = vector.shape_cast %61 : vector<1x1x8x128xbf16> to vector<8x128xbf16>
    %cst_39 = arith.constant dense<0.000000e+00> : vector<16x128xf32>
    %63 = tpu.matmul %0, %62, %cst_39 {dimension_numbers = #tpu.dot_dimension_numbers<[1], [0], [0], [1], [0, 0, 1, 1], [], []>} : vector<16x8xbf16>, vector<8x128xbf16>, vector<16x128xf32> -> vector<16x128xf32>
    %64 = vector.broadcast %1 : vector<16x1xf32> to vector<16x128xf32>
    %65 = arith.addf %63, %64 : vector<16x128xf32>
    %66 = arith.addf %59, %65 : vector<16x128xf32>
    %cst_40 = arith.constant 1.000000e+00 : f32
    %67 = vector.broadcast %cst_40 : f32 to vector<16x128xf32>
    %68 = arith.cmpf oge, %66, %67 : vector<16x128xf32>
    %cst_41 = arith.constant 1.000000e+00 : f32
    %cst_42 = arith.constant 0.000000e+00 : f32
    %69 = vector.broadcast %cst_41 : f32 to vector<16x128xf32>
    %70 = vector.broadcast %cst_42 : f32 to vector<16x128xf32>
    %71 = arith.select %68, %69, %70 : vector<16x128xi1>, vector<16x128xf32>
    %72 = arith.truncf %71 : vector<16x128xf32> to vector<16x128xbf16>
    %73 = arith.index_cast %c3_i32 : i32 to index
    %c0_43 = arith.constant 0 : index
    %c0_44 = arith.constant 0 : index
    %c0_45 = arith.constant 0 : index
    %74 = vector.load %arg5[%73, %c0_43, %c0_44, %c0_45] : memref<4x1x16x128xbf16, #tpu.memory_space<vmem>>, vector<1x1x16x128xbf16>
    %75 = vector.shape_cast %74 : vector<1x1x16x128xbf16> to vector<16x128xbf16>
    %76 = vector.shape_cast %72 : vector<16x128xbf16> to vector<1x1x16x128xbf16>
    tpu.vector_store %arg5[%73, %c0_43, %c0_44, %c0_45], %76 {strides = array<i32>} : memref<4x1x16x128xbf16, #tpu.memory_space<vmem>>, vector<1x1x16x128xbf16>,
    %cst_46 = arith.constant 0.000000e+00 : f32
    %77 = vector.broadcast %cst_46 : f32 to vector<16x128xf32>
    %78 = arith.select %68, %77, %66 : vector<16x128xi1>, vector<16x128xf32>
    %c4_i32 = arith.constant 4 : i32
    return
  }
  func.func @transform_0(%arg0: i32, %arg1: i32) -> (i32, i32, i32, i32) {
    %c0_i32 = arith.constant 0 : i32
    %c0_i32_0 = arith.constant 0 : i32
    %c0_i32_1 = arith.constant 0 : i32
    return %c0_i32, %arg0, %c0_i32_0, %arg1 : i32, i32, i32, i32
  }
  func.func @transform_1(%arg0: i32, %arg1: i32) -> (i32, i32) {
    %c0_i32 = arith.constant 0 : i32
    %c0_i32_0 = arith.constant 0 : i32
    %c0_i32_1 = arith.constant 0 : i32
    return %c0_i32, %c0_i32_0 : i32, i32
  }
  func.func @transform_2(%arg0: i32, %arg1: i32) -> (i32, i32) {
    %c0_i32 = arith.constant 0 : i32
    %c0_i32_0 = arith.constant 0 : i32
    %c0_i32_1 = arith.constant 0 : i32
    return %c0_i32, %c0_i32_0 : i32, i32
  }
  func.func @transform_3(%arg0: i32, %arg1: i32) -> (i32, i32, i32, i32) {
    %c0_i32 = arith.constant 0 : i32
    %c0_i32_0 = arith.constant 0 : i32
    %c0_i32_1 = arith.constant 0 : i32
    return %c0_i32, %arg0, %c0_i32_0, %arg1 : i32, i32, i32, i32
  }
}

</mosaic_0001>

<bundles_post_ra>
// kernel: tpu_custom_call.1
= control target key start
LH: loop header
LB: loop body
LE: loop exit
PB: predicated region body
PF: predicated region fallthrough
CT: control target
= control target key end

     0   :  { %8 = vsyncpa [#allocation3], 0  ;;  %s1110_s0 = inlined_call_operand.hbm [shape: bf16[4,2,8,128], index: 0, kind: input, shape index: {}]   ;;  %s1111_s1 = inlined_call_operand.vmem [shape: bf16[16,8], index: 1, kind: input, shape index: {}]   ;;  %s1112_s2 = inlined_call_operand.vmem [shape: f32[16,1], index: 2, kind: input, shape index: {}]   ;;  %s1113_s3 = inlined_call_operand.hbm [shape: bf16[4,2,16,128], index: 3, kind: output, shape index: {}]  }
   0x1   :  { %10 = vsyncpa [#allocation3 + $0x1], 0 }
   0x2   :  { %11 = vsyncpa [#allocation4], 0 }
   0x3   :  { %13 = vsyncpa [#allocation4 + $0x1], 0  ;;  %s909_s12 = smov 0   ;;  %s911_s13 = smov 0  }
   0x4   :  { %s913_s14 = smov 0   ;;  %s915_s15 = smov 0  }
   0x5   :  { %s917_s16 = smov 0   ;;  %s919_s17 = smov 0  }
   0x6 LB: > { %s614_s18 = sadd.s32 4294967295, %s873_s17   ;;  %s615_s19 = sadd.s32 4294967294, %s873_s17   ;;  %s873_s17 = sphi %s919_s17, %s19_s17   ;;  %s869_s16 = sphi %s917_s16, %s1127_s16   ;;  %s865_s15 = sphi %s915_s15, %s1126_s15   ;;  %s861_s14 = sphi %s913_s14, %s1125_s14   ;;  %s857_s13 = sphi %s911_s13, %s1124_s13   ;;  %s853_s12 = sphi %s909_s12, %s1123_s12  }
   0x7   : > { %s31_s20 = sadd.s32 1, %s869_s16  ;;  %s40_s21 = sadd.s32 1, %s861_s14 }
   0x8   : > { %p33_p0 = scmp.ge.s32.totalorder %s31_s20, 2  ;;  %p47_p1 = scmp.ne.s32.totalorder %s861_s14, %s857_s13 }
   0x9   : > { %p48_p2 = scmp.eq.s32.totalorder %s873_s17, 0  ;;  %p53_p3 = scmp.ne.s32.totalorder %s857_s13, %s853_s12 }
   0xa   : > { %s1129_s20 = smov (%p33_p0, %s31_s20), 0  ;;  %p54_p5 = scmp.eq.s32.totalorder %s614_s18, 0 }
   0xb   : > { %p950_p4 = por %p48_p2, %p47_p1  ;;  %s35_s23 = ssub.s32 %s869_s16, %s1129_s20 }
   0xc   : > { %p121_p6 = scmp.eq.s32.totalorder %s614_s18, 1  ;;  %p38_p7 = scmp.eq.s32.totalorder %s35_s23, 0 }
   0xd   : > { %p956_p8 = por %p54_p5, %p53_p3  ;;  %p127_p10 = scmp.eq.s32.totalorder %s615_s19, 1 }
   0xe   : > { %p960_p9 = por %p121_p6, %p47_p1  ;;  %p724_p13 = scmp.lt.s32.totalorder %s873_s17, 2 }
   0xf   : > { %s965_s26 = scalar_select %p38_p7, %s861_s14, %s40_s21  }
  0x10   : > { %s1117_s25 = scalar_select %p960_p9, 1, 0 }
  0x11   : > { %p967_p11 = por %p127_p10, %p53_p3  ;;  %s153_s28 = sand.u32 1, %s861_s14  }
  0x12   : > { %s618_s29 = sshll.u32 %s153_s28, 4  ;;  %s619_s30 = sshll.u32 %s869_s16, 6 }
  0x13   : > { %s1118_s27 = scalar_select %p967_p11, 1, 0 }
  0x14   : > { %s978_s6 = scalar_lea.hbm %s1110_s0, %s619_s30  ;;  %s157_s7 = scalar_lea.vmem [#allocation2], %s618_s29 }
  0x15   : > { %s164_s8 = sshll.u32 %s157_s7, 4  ;;  %p984_p0 = pnand %p724_p13, %p950_p4  ;;  %s980_s8 = int_to_ptr.vmem [resolvable:$true] %s164_s8 }
  0x16   : > { %s988_s10 = scalar_lea.sflag [#allocation3], %s153_s28  ;;  %s789_s11 = scalar_lea.hbm %s978_s6, 256 }
  0x17   : > { %p790_p1 = scmp.ne.s32.totalorder %s978_s6, %s789_s11  ;;  %p791_p2 = pneg %p984_p0 }
  0x18   : > { %s794_s21 = scalar_lea.hbm %s1110_s0, 512  ;;  %p795_p4 = scmp.lt.u32.totalorder %s978_s6, %s1110_s0 }
  0x19   : > { %p792_p3 = pnand %p791_p2, %p790_p1  ;;  %p796_p6 = scmp.lt.u32.totalorder %s794_s21, %s789_s11 }
  0x1a   : > { %p798_p10 = scmp.lt.u32.totalorder %s789_s11, %s978_s6 }
  0x1b   : > { %p793_p5 = pneg %p792_p3  ;;  %p797_p7 = por %p796_p6, %p795_p4 }
  0x1d   : > { %p799_p13 = por %p798_p10, %p797_p7 }
  0x1f   : > { %p800_p12 = pnand %p799_p13, %p793_p5 }
  0x21   : > { %803 = shalt.err (!%p800_p12)
}
  0x22   : > { %s804_s28 = scalar_lea.vmem %s980_s8, 256  ;;  %s875_s29 = smov [#allocation2]  }
  0x23   : > { %p805_p1 = scmp.ne.s32.totalorder %s980_s8, %s804_s28  ;;  %s809_s30 = sshll.u32 %s875_s29, 4  ;;  %s810_s30 = int_to_ptr.vmem [resolvable:$false] %s809_s30 }
  0x24   : > { %s811_s4 = scalar_lea.vmem %s810_s30, 512  ;;  %p812_p9 = scmp.lt.s32.totalorder %s980_s8, %s810_s30 }
  0x25   : > { %p807_p3 = pnand %p805_p1, %p791_p2  ;;  %p813_p4 = scmp.lt.s32.totalorder %s811_s4, %s804_s28 }
  0x27   : > { %p808_p11 = pneg %p807_p3  ;;  %p814_p6 = por %p813_p4, %p812_p9 }
  0x29   : > { %p815_p7 = pnand %p814_p6, %p808_p11 }
  0x2b   : > { %818 = shalt.err (!%p815_p7)
}
  0x2c   : > { %s876_s5 = smov 128   ;;  %s877_s7 = smov 64  }
  0x2d   : > { %s878_s11 = smov 4   ;;  %p620_p12 = scmp.ge.s32.totalorder %s873_s17, 1 }
  0x2e   : > { %719 = dma.hbm_to_vmem [thread:$0]  (!%p984_p0), %s978_s6, 256, %s980_s8, %s988_s10, %s876_s5, %s877_s7, %s878_s11  }
  0x2f   : > { %p172_p2 = scmp.lt.s32.totalorder %s873_s17, 3 }
  0x31   : > { %p173_p5 = pnand %p620_p12, %p172_p2 }
  0x32   : > { %s1019_s18 = sand.u32 (!%p173_p5), 1, %s857_s13  }
  0x33   : > { %176 = sbr.rel (%p173_p5) target bundleno = 311 (0x137), region = 32  ;;  %s621_s19 = sshll.u32 (!%p173_p5), %s1019_s18, 4 }
  0x34   : > { %s179_s21 = scalar_lea.sflag (!%p173_p5), [#allocation3], %s1019_s18  ;;  %s182_s22 = scalar_lea.vmem (!%p173_p5), [#allocation2], %s621_s19 }
  0x3a   : > { %844 = dma.done.wait (%p956_p8), %s179_s21, 256  }
  0x3b   : > { %846 = vsyncadd (%p956_p8), %s179_s21, 4294967040  ;;  %v879_v0 = vmov 0.0   ;;  %vm880_vm0 = vmmov 0   ;;  %v881_v1 = vmov 0   ;;  %vm230_vm1 = vcmask 1043456   ;;  %v788_v6 = vld [vmem:[%s1111_s1] sm:$0xff]  }
  0x3c   : > { %682 = vmatprep.subr.bf16.mxu0 %v879_v0  ;;  %688 = vmatprep.subr.bf16.mxu1 %v879_v0  ;;  %v210_v2 = vld [vmem:[%s182_s22] sm:$0xf]  ;;  %v627_v3 = vld [vmem:[%s182_s22 + $0x4] sm:$0xf]  ;;  %vm226_vm2 = vcmask 64512   ;;  %v209_v12 = vld [vmem:[%s1112_s2 + $0x8] sm:$0xff] }
  0x3d   : > { %684 = vmatprep.mubr.msk.bf16.mxu0 %vm880_vm0, %v879_v0  ;;  %690 = vmatprep.mubr.msk.bf16.mxu1 %vm880_vm0, %v879_v0  ;;  %v232_v4 = vsel %vm230_vm1, %v210_v2, 0  ;;  %v296_v5 = vsel %vm230_vm1, %v627_v3, 0  ;;  %v208_v7 = vld [vmem:[%s1112_s2] sm:$0xff]  ;;  %v633_v8 = vld [vmem:[%s182_s22 + $0x8] sm:$0xf]  ;;  %s622_s28 = sshll.u32 %s1019_s18, 5 }
  0x3e   : > { %787 = vset.pattern.permute.xlu0 %v881_v1  ;;  %683 = vmatpush3.bf16.msra.mxu0 %v232_v4  ;;  %v639_v9 = vld [vmem:[%s182_s22 + $0xc] sm:$0xf]  ;;  %v361_v10 = vsel %vm230_vm1, %v633_v8, 0  ;;  %s1055_s29 = scalar_lea.vmem [#allocation5], %s622_s28  ;;  %s487_s30 = scalar_lea.sflag [#allocation4], %s1019_s18 }
  0x3f   : > { %689 = vmatpush3.bf16.msra.mxu1 %v296_v5  ;;  %694 = vmatprep.subr.bf16.mxu0 %v879_v0  ;;  %v426_v11 = vsel %vm230_vm1, %v639_v9, 0 }
  0x40   : > { %700 = vmatprep.subr.bf16.mxu1 %v879_v0  ;;  %213 = vperm.xlu0 %787, %v208_v7  }
  0x41   : > { %685 = vmatmul.mubr.msk.bf16.vlgmr.msra.gmra.mrb[0].mxu0 %vm226_vm2, %v788_v6 }
  0x42   : > { %691 = vmatmul.mubr.msk.bf16.vlgmr.msra.gmra.mrb[0].mxu1 %vm226_vm2, %v788_v6  ;;  %695 = vmatpush3.bf16.msra.mxu0 %v361_v10 }
  0x43   : > { %701 = vmatpush3.bf16.msra.mxu1 %v426_v11  ;;  %696 = vmatprep.mubr.msk.bf16.mxu0 %vm880_vm0, %v879_v0 }
  0x44   : > { %702 = vmatprep.mubr.msk.bf16.mxu1 %vm880_vm0, %v879_v0  ;;  %218 = vperm.xlu0 %787, %v209_v12  }
  0x49   : > { %697 = vmatmul.mubr.msk.bf16.vlgmr.msra.gmra.mrb[4].mxu0 %vm226_vm2, %v788_v6 }
  0x4a   : > { %703 = vmatmul.mubr.msk.bf16.vlgmr.msra.gmra.mrb[4].mxu1 %vm226_vm2, %v788_v6 }
  0xbf   : > { %v214_v13 = vpop.permute.xlu0 %213 }
  0xc3   : > { %v219_v14 = vpop.permute.xlu0 %218 }
 0x114   : > { %v268_v15 = vpop.f32.mrb[0].mxu0 }
 0x115   : > { %v332_v16 = vpop.f32.mrb[0].mxu1  ;;  %v269_v17 = vadd.f32 %v268_v15, %v214_v13  ;;  %v686_v18 = vpop.f32.mrb[1].mxu0 }
 0x116   : > { %v692_v19 = vpop.f32.mrb[1].mxu1  ;;  %v271_v20 = vpop.f32.mrb[2].mxu0  ;;  %v333_v22 = vadd.f32 %v332_v16, %v214_v13 }
 0x117   : > { %v335_v21 = vpop.f32.mrb[2].mxu1  ;;  %vm277_vm3 = vcmp.ge.f32.partialorder %v269_v17, 1.0  ;;  %v272_v23 = vadd.f32 %v271_v20, %v219_v14  ;;  %v687_v24 = vpop.f32.mrb[3].mxu0 }
 0x118   : > { %v693_v25 = vpop.f32.mrb[3].mxu1  ;;  %v291_v26 = vsel %vm277_vm3, 0.0, %v269_v17  ;;  %v336_v28 = vadd.f32 %v335_v21, %v219_v14  ;;  %v279_v29 = vsel %vm277_vm3, 1.0, %v879_v0 }
 0x119   : > { %v339_v27 = vadd.f32 %v333_v22, %v291_v26  ;;  %vm278_vm4 = vcmp.ge.f32.partialorder %v272_v23, 1.0 }
 0x11a   : > { %v280_v30 = vsel %vm278_vm4, 1.0, %v879_v0  ;;  %v292_v31 = vsel %vm278_vm4, 0.0, %v272_v23 }
 0x11b   : > { %v660_v32 = vpack.c.bf16 %v280_v30, %v279_v29  ;;  %v340_v33 = vadd.f32 %v336_v28, %v292_v31  ;;  %vm341_vm5 = vcmp.ge.f32.partialorder %v339_v27, 1.0 }
 0x11c   : > { %v397_v34 = vpop.f32.mrb[4].mxu0  ;;  %v343_v39 = vsel %vm341_vm5, 1.0, %v879_v0  ;;  %v356_v40 = vsel %vm341_vm5, 0.0, %v339_v27 }
 0x11d   : > { %v462_v35 = vpop.f32.mrb[4].mxu1  ;;  %661 = vst [vmem:[%s1055_s29] sm:$0xff] %v660_v32   ;;  %v398_v36 = vadd.f32 %v397_v34, %v214_v13  ;;  %v698_v37 = vpop.f32.mrb[5].mxu0  ;;  %vm342_vm6 = vcmp.ge.f32.partialorder %v340_v33, 1.0 }
 0x11e   : > { %v704_v38 = vpop.f32.mrb[5].mxu1  ;;  %v344_v41 = vsel %vm342_vm6, 1.0, %v879_v0  ;;  %v400_v42 = vpop.f32.mrb[6].mxu0  ;;  %v357_v49 = vsel %vm342_vm6, 0.0, %v340_v33  ;;  %v463_v50 = vadd.f32 %v462_v35, %v214_v13 }
 0x11f   : > { %v465_v43 = vpop.f32.mrb[6].mxu1  ;;  %v404_v44 = vadd.f32 %v398_v36, %v356_v40  ;;  %v663_v45 = vpack.c.bf16 %v344_v41, %v343_v39  ;;  %v401_v46 = vadd.f32 %v400_v42, %v219_v14  ;;  %v699_v47 = vpop.f32.mrb[7].mxu0 }
 0x120   : > { %v705_v48 = vpop.f32.mrb[7].mxu1  ;;  %v466_v54 = vadd.f32 %v465_v43, %v219_v14 }
 0x121   : > { %vm406_vm7 = vcmp.ge.f32.partialorder %v404_v44, 1.0  ;;  %671 = vst [vmem:[%s1055_s29 + $0x8] sm:$0xff] %v663_v45   ;;  %v405_v51 = vadd.f32 %v401_v46, %v357_v49 }
 0x122   : > { %v421_v52 = vsel %vm406_vm7, 0.0, %v404_v44  ;;  %v408_v55 = vsel %vm406_vm7, 1.0, %v879_v0 }
 0x123   : > { %v469_v53 = vadd.f32 %v463_v50, %v421_v52  ;;  %vm407_vm8 = vcmp.ge.f32.partialorder %v405_v51, 1.0 }
 0x124   : > { %v409_v56 = vsel %vm407_vm8, 1.0, %v879_v0  ;;  %v422_v57 = vsel %vm407_vm8, 0.0, %v405_v51 }
 0x125   : > { %vm471_vm9 = vcmp.ge.f32.partialorder %v469_v53, 1.0  ;;  %v666_v58 = vpack.c.bf16 %v409_v56, %v408_v55  ;;  %v470_v59 = vadd.f32 %v466_v54, %v422_v57 }
 0x126   : > { %v473_v60 = vsel %vm471_vm9, 1.0, %v879_v0 }
 0x127   : > { %672 = vst [vmem:[%s1055_s29 + $0x10] sm:$0xff] %v666_v58   ;;  %vm472_vm10 = vcmp.ge.f32.partialorder %v470_v59, 1.0 }
 0x128   : > { %v474_v61 = vsel %vm472_vm10, 1.0, %v879_v0 }
 0x129   : > { %v669_v62 = vpack.c.bf16 %v474_v61, %v473_v60 }
 0x12b   : > { %673 = vst [vmem:[%s1055_s29 + $0x18] sm:$0xff] %v669_v62  }
 0x12c   : > { %s658_s4 = sshll.u32 %s865_s15, 7  ;;  %s517_s5 = sshll.u32 %s1055_s29, 4  ;;  %s518_s5 = int_to_ptr.vmem [resolvable:$true] %s517_s5 }
 0x12d   : > { %s500_s19 = scalar_lea.hbm %s1113_s3, %s658_s4  ;;  %s882_s21 = smov 128  }
 0x12e   : > { %p1120_p8 = scmp.ne.s32.totalorder %s1117_s25, 0  ;;  %s883_s18 = smov 256  }
 0x12f   : > { %s884_s22 = smov 2   ;;  %s885_s24 = smov 64  }
 0x130   : > { %708 = sst [smem:[#allocation7]] (%p1120_p8), %s882_s21  ;;  %s886_s15 = smov 4  }
 0x131   : > { %709 = sst [smem:[#allocation7 + $0x1]] (%p1120_p8), %s883_s18  ;;  %s887_s6 = smov [#allocation6]  }
 0x132   : > { %710 = sst [smem:[#allocation7 + $0x2]] (%p1120_p8), %s884_s22  ;;  %s888_s8 = smov 0  }
 0x133   : > { %711 = sst [smem:[#allocation7 + $0x3]] (%p1120_p8), %s885_s24 }
 0x134   : > { %712 = sst [smem:[#allocation7 + $0x4]] (%p1120_p8), %s885_s24 }
 0x135   : > { %713 = sst [smem:[#allocation7 + $0x5]] (%p1120_p8), %s886_s15 }
 0x136   : > { %714 = dma.general (%p1120_p8), %s518_s5, 512, %s500_s19, %s487_s30, %s887_s6, [#allocation7], %s888_s8, 0  }
 0x137 PF: > { %s545_s9 = sand.u32 1, %s853_s12   ;;  %p1121_p9 = scmp.ne.s32.totalorder %s1118_s27, 0 }
 0x138   : > { %p1122_p11 = scmp.ge.s32.totalorder %s873_s17, 2  ;;  %s546_s10 = scalar_lea.sflag [#allocation4], %s545_s9 }
 0x13a   : > { %p721_p0 = pnand %p1122_p11, %p1121_p9 }
 0x13c   : > { %848 = dma.done.wait (!%p721_p0), %s546_s10, 512  }
 0x13d   : > { %850 = vsyncadd (!%p721_p0), %s546_s10, 4294966784  ;;  %s19_s17 = sadd.s32 1, %s873_s17   ;;  %s1123_s12 = smov %s857_s13 }
 0x13e   : > { %p16_p10 = scmp.ge.s32.totalorder %s19_s17, 4   ;;  %s1124_s13 = smov %s861_s14 }
 0x13f   : > { %s1125_s14 = smov %s965_s26  ;;  %s1126_s15 = smov %s869_s16 }
 0x140   : > { %s1127_s16 = smov %s1129_s20  ;;  %18 = sbr.rel (!%p16_p10) target bundleno = 6 (0x6), region = 88 }
 0x147   :  { %551 = vsyncpa [#allocation3], 1 }
 0x148   :  { %553 = vsyncpa [#allocation3 + $0x1], 1 }
 0x149   :  { %554 = vsyncpa [#allocation4], 1 }
 0x14a   :  { %556 = vsyncpa [#allocation4 + $0x1], 1 }

</bundles_post_ra>
